<compile_context>
chip_gen: v7x
topology: tpu7x:2x2x1
jax: 0.10.0
libtpu: 0.0.40
codegen_flags: <defaults>
</compile_context>

<pallas_src>
import functools

import jax
import jax.numpy as jnp
from jax.experimental import pallas as pl
from jax.experimental.pallas import tpu as pltpu


def _disc_kernel(x_ref, w1_ref, b1_ref, w2_ref, b2_ref, o_ref):
    # x_ref:  (C, bn)      w1_ref: (H, C)    b1_ref: (H, 1)
    # w2_ref: (1, H)       b2_ref: (1, 1) in SMEM      o_ref: (1, bn)
    x = x_ref[...]

    # Layer 1: (H, C) @ (C, bn) -> (H, bn).  K = C = 3, so MXU utilization is
    # irrelevant here -- the kernel is bandwidth/overhead bound; what matters is
    # that the result is lane-dense over the batch.
    h = jnp.dot(w1_ref[...], x, preferred_element_type=jnp.float32) + b1_ref[...]

    # LeakyReLU(0.2) on the VPU.
    h = jnp.where(h > 0, h, 0.2 * h)

    # Layer 2: (1, H) @ (H, bn) -> (1, bn).  Fills the MXU N dimension and keeps
    # the store lane-dense (bn is a multiple of 128).
    z = (jnp.dot(w2_ref[...], h, preferred_element_type=jnp.float32)
         + b2_ref[0, 0])

    # Sigmoid: exp + approx reciprocal both run on the EUP slot, keeping the
    # VALU slot free (z is now block_n lane-dense elements, not 1 lane).
    denom = 1.0 + jnp.exp(-z)
    o_ref[...] = pl.reciprocal(denom, approx=True).astype(o_ref.dtype)


@functools.partial(jax.jit, static_argnames=("block_n",))
def discriminator_forward(x, w1, b1, w2, b2, *, block_n=1024):
    """Forward pass of the discriminator MLP.

    x:  (N, C) float32
    w1: (H, C) float32   (PyTorch layout: [out_features, in_features])
    b1: (H,)   float32
    w2: (1, H) float32
    b2: (1,)   float32
    Returns (N, 1) float32 in [0, 1].

    block_n should be a multiple of 128; 512-2048 is a good range.  Per-step
    VMEM footprint (f32): x tile C*block_n*4 B + hidden 128*block_n*4 B
    (~0.5 MiB at block_n=1024), comfortably under the 32 MiB scoped default on
    all generations, so no vmem_limit_bytes override is needed.
    """
    n, c = x.shape
    hdim = w1.shape[0]
    assert block_n % 128 == 0, "block_n must be a multiple of 128"

    # Pad the batch instead of asserting divisibility, so large tiles work for
    # arbitrary N.  Padded rows are sliced off after the kernel.
    n_pad = pl.cdiv(n, block_n) * block_n
    x_t = jnp.zeros((c, n_pad), x.dtype).at[:, :n].set(x.T)   # batch on lanes
    b1_col = b1.reshape(hdim, 1).astype(jnp.float32)
    b2_s = b2.reshape(1, 1).astype(jnp.float32)

    # For realistic N the grid has many steps; the "parallel" semantics shard
    # them across v7x's 2 TensorCores (v5e/v6e have 1 TC, so it is a no-op).
    grid = (n_pad // block_n,)

    out = pl.pallas_call(
        _disc_kernel,
        out_shape=jax.ShapeDtypeStruct((1, n_pad), jnp.float32),
        grid_spec=pltpu.PrefetchScalarGridSpec(
            num_scalar_prefetch=0,
            grid=grid,
            in_specs=[
                pl.BlockSpec((c, block_n), lambda i: (0, i)),      # x tile
                pl.BlockSpec((hdim, c), lambda i: (0, 0)),         # W1 (resident)
                pl.BlockSpec((hdim, 1), lambda i: (0, 0)),         # b1 (resident)
                pl.BlockSpec((1, hdim), lambda i: (0, 0)),         # W2 (resident)
                pl.BlockSpec(memory_space=pltpu.MemorySpace.SMEM), # b2 scalar
            ],
            out_specs=pl.BlockSpec((1, block_n), lambda i: (0, i)),
        ),
        compiler_params=pltpu.CompilerParams(
            dimension_semantics=("parallel",),
        ),
    )(x_t, w1, b1_col, w2, b2_s)

    return out[0, :n].reshape(n, 1)


def init_params(key, in_channels=3, hidden=128, out_channels=1):
    """Deterministic init mimicking PyTorch nn.Linear (U[-1/sqrt(fan_in), ...]).
    Weights kept in PyTorch layout [out_features, in_features]."""
    k1, k2, k3, k4 = jax.random.split(key, 4)
    bound1 = 1.0 / jnp.sqrt(in_channels)
    bound2 = 1.0 / jnp.sqrt(hidden)
    w1 = jax.random.uniform(k1, (hidden, in_channels), jnp.float32, -bound1, bound1)
    b1 = jax.random.uniform(k2, (hidden,), jnp.float32, -bound1, bound1)
    w2 = jax.random.uniform(k3, (out_channels, hidden), jnp.float32, -bound2, bound2)
    b2 = jax.random.uniform(k4, (out_channels,), jnp.float32, -bound2, bound2)
    return w1, b1, w2, b2


def _reference(x, w1, b1, w2, b2):
    h = x @ w1.T + b1
    h = jnp.where(h > 0, h, 0.2 * h)
    z = h @ w2.T + b2
    return jax.nn.sigmoid(z)


if __name__ == "__main__":
    key = jax.random.PRNGKey(0)
    kx, kp = jax.random.split(key)

    in_channels = 3
    batch = 16          # small demo shape; not a multiple of block_n (pads in wrapper)
    x = jax.random.normal(kx, (batch, in_channels), jnp.float32)
    w1, b1, w2, b2 = init_params(kp, in_channels=in_channels, hidden=128, out_channels=1)

    out = discriminator_forward(x, w1, b1, w2, b2, block_n=256)
    out = jax.block_until_ready(out)

    ref = _reference(x, w1, b1, w2, b2)
    assert out.shape == (batch, 1), out.shape
    # approx=True reciprocal (EUP vrcp) is slightly inexact -> modest tolerance.
    assert jnp.allclose(out, ref, atol=5e-3, rtol=5e-3), "mismatch vs. reference"

    print("KERNEL_OK")
</pallas_src>

<mosaic_0001>
module attributes {stable_mosaic.version = 11 : i64} {
  func.func @_disc_kernel(%arg0: i32, %arg1: memref<3x256xf32, #tpu.memory_space<vmem>>, %arg2: memref<128x3xf32, #tpu.memory_space<vmem>>, %arg3: memref<128x1xf32, #tpu.memory_space<vmem>>, %arg4: memref<1x128xf32, #tpu.memory_space<vmem>>, %arg5: memref<1x1xf32, #tpu.memory_space<smem>>, %arg6: memref<1x256xf32, #tpu.memory_space<vmem>>) attributes {dimension_semantics = [#tpu.dimension_semantics<parallel>], iteration_bounds = array<i64: 1>, scalar_prefetch = 0 : i64, scratch_operands = 0 : i64, tpu.core_type = #tpu.core_type<tc>, window_params = [{transform_indices = @transform_0, window_bounds = array<i64: 3, 256>}, {pipeline_mode = #tpu.pipeline_mode<synchronous>, transform_indices = @transform_1, window_bounds = array<i64: 128, 3>}, {pipeline_mode = #tpu.pipeline_mode<synchronous>, transform_indices = @transform_2, window_bounds = array<i64: 128, 1>}, {pipeline_mode = #tpu.pipeline_mode<synchronous>, transform_indices = @transform_3, window_bounds = array<i64: 1, 128>}, {transform_indices = @transform_4, window_bounds = array<i64: 1, 1>}, {transform_indices = @transform_5, window_bounds = array<i64: 1, 256>}]} {
    %c0 = arith.constant 0 : index
    %c0_0 = arith.constant 0 : index
    %0 = vector.load %arg1[%c0, %c0_0] : memref<3x256xf32, #tpu.memory_space<vmem>>, vector<3x256xf32>
    %c0_1 = arith.constant 0 : index
    %c0_2 = arith.constant 0 : index
    %1 = vector.load %arg2[%c0_1, %c0_2] : memref<128x3xf32, #tpu.memory_space<vmem>>, vector<128x3xf32>
    %cst = arith.constant dense<0.000000e+00> : vector<128x256xf32>
    %2 = tpu.matmul %1, %0, %cst {dimension_numbers = #tpu.dot_dimension_numbers<[1], [0], [0], [1], [0, 0, 1, 1], [], []>} : vector<128x3xf32>, vector<3x256xf32>, vector<128x256xf32> -> vector<128x256xf32>
    %c0_3 = arith.constant 0 : index
    %c0_4 = arith.constant 0 : index
    %3 = vector.load %arg3[%c0_3, %c0_4] : memref<128x1xf32, #tpu.memory_space<vmem>>, vector<128x1xf32>
    %4 = vector.broadcast %3 : vector<128x1xf32> to vector<128x256xf32>
    %5 = arith.addf %2, %4 : vector<128x256xf32>
    %cst_5 = arith.constant 0.000000e+00 : f32
    %6 = vector.broadcast %cst_5 : f32 to vector<128x256xf32>
    %7 = arith.cmpf ogt, %5, %6 : vector<128x256xf32>
    %cst_6 = arith.constant 2.000000e-01 : f32
    %8 = vector.broadcast %cst_6 : f32 to vector<128x256xf32>
    %9 = arith.mulf %8, %5 : vector<128x256xf32>
    %10 = arith.select %7, %5, %9 : vector<128x256xi1>, vector<128x256xf32>
    %c0_7 = arith.constant 0 : index
    %c0_8 = arith.constant 0 : index
    %11 = vector.load %arg4[%c0_7, %c0_8] : memref<1x128xf32, #tpu.memory_space<vmem>>, vector<1x128xf32>
    %cst_9 = arith.constant dense<0.000000e+00> : vector<1x256xf32>
    %12 = tpu.matmul %11, %10, %cst_9 {dimension_numbers = #tpu.dot_dimension_numbers<[1], [0], [0], [1], [0, 0, 1, 1], [], []>} : vector<1x128xf32>, vector<128x256xf32>, vector<1x256xf32> -> vector<1x256xf32>
    %c0_10 = arith.constant 0 : index
    %c0_11 = arith.constant 0 : index
    %13 = memref.load %arg5[%c0_10, %c0_11] : memref<1x1xf32, #tpu.memory_space<smem>>
    %14 = vector.broadcast %13 : f32 to vector<1x256xf32>
    %15 = arith.addf %12, %14 : vector<1x256xf32>
    %cst_12 = arith.constant 0.000000e+00 : f32
    %16 = vector.broadcast %cst_12 : f32 to vector<1x256xf32>
    %17 = arith.subf %16, %15 : vector<1x256xf32>
    %18 = math.exp %17 : vector<1x256xf32>
    %cst_13 = arith.constant 1.000000e+00 : f32
    %19 = vector.broadcast %cst_13 : f32 to vector<1x256xf32>
    %20 = arith.addf %19, %18 : vector<1x256xf32>
    %21 = tpu.reciprocal %20 {approx = true} : vector<1x256xf32> -> vector<1x256xf32>
    %c0_14 = arith.constant 0 : index
    %c0_15 = arith.constant 0 : index
    %22 = vector.load %arg6[%c0_14, %c0_15] : memref<1x256xf32, #tpu.memory_space<vmem>>, vector<1x256xf32>
    tpu.vector_store %arg6[%c0_14, %c0_15], %21 {strides = array<i32>} : memref<1x256xf32, #tpu.memory_space<vmem>>, vector<1x256xf32>,
    return
  }
  func.func @transform_0(%arg0: i32) -> (i32, i32) {
    %c0_i32 = arith.constant 0 : i32
    %c0_i32_0 = arith.constant 0 : i32
    return %c0_i32, %arg0 : i32, i32
  }
  func.func @transform_1(%arg0: i32) -> (i32, i32) {
    %c0_i32 = arith.constant 0 : i32
    %c0_i32_0 = arith.constant 0 : i32
    %c0_i32_1 = arith.constant 0 : i32
    return %c0_i32, %c0_i32_0 : i32, i32
  }
  func.func @transform_2(%arg0: i32) -> (i32, i32) {
    %c0_i32 = arith.constant 0 : i32
    %c0_i32_0 = arith.constant 0 : i32
    %c0_i32_1 = arith.constant 0 : i32
    return %c0_i32, %c0_i32_0 : i32, i32
  }
  func.func @transform_3(%arg0: i32) -> (i32, i32) {
    %c0_i32 = arith.constant 0 : i32
    %c0_i32_0 = arith.constant 0 : i32
    %c0_i32_1 = arith.constant 0 : i32
    return %c0_i32, %c0_i32_0 : i32, i32
  }
  func.func @transform_4(%arg0: i32) -> (i32, i32) {
    %c0_i32 = arith.constant 0 : i32
    %c0_i32_0 = arith.constant 0 : i32
    %c0_i32_1 = arith.constant 0 : i32
    return %c0_i32, %c0_i32_0 : i32, i32
  }
  func.func @transform_5(%arg0: i32) -> (i32, i32) {
    %c0_i32 = arith.constant 0 : i32
    %c0_i32_0 = arith.constant 0 : i32
    return %c0_i32, %arg0 : i32, i32
  }
}

</mosaic_0001>

<bundles_post_ra>
// kernel: discriminator_forward.1
= control target key start
LH: loop header
LB: loop body
LE: loop exit
PB: predicated region body
PF: predicated region fallthrough
CT: control target
= control target key end

     0   :  { %vm185_vm0 = vcmask 1042432   ;;  %v622_v1 = vmov 0.0   ;;  %v623_v2 = vmov 0   ;;  %vm136_vm1 = vcmask 23552   ;;  %s796_s0 = inlined_call_operand.vmem [shape: f32[3,256], index: 0, kind: input, shape index: {}]   ;;  %s797_s1 = inlined_call_operand.vmem [shape: f32[128,3], index: 1, kind: input, shape index: {}]   ;;  %s798_s2 = inlined_call_operand.vmem [shape: f32[128,1], index: 2, kind: input, shape index: {}]   ;;  %s799_s3 = inlined_call_operand.vmem [shape: f32[1,128], index: 3, kind: input, shape index: {}]   ;;  %s800_s4 = inlined_call_operand.<no memory space> [shape: f32[1,1], index: 4, kind: input, shape index: {}]   ;;  %s801_s5 = inlined_call_operand.vmem [shape: f32[1,256], index: 5, kind: output, shape index: {}]  }
   0x1   :  { %v21_v0 = vld [vmem:[%s796_s0] sm:$0x77]  ;;  %254 = vmatprep.mubr.f32.mxu0 %v622_v1  ;;  %611 = vset.pattern.permute.xlu0 %v623_v2  ;;  %v23_v6 = vld [vmem:[%s797_s1 + $0x8] sm:$0xff]  ;;  %v40_v7 = vld [vmem:[%s798_s2 + $0x10] sm:$0xff] }
   0x2   :  { %v135_v3 = vcombine.high %v21_v0, %v21_v0  ;;  %612 = vset.pattern.permute.xlu1 %v623_v2  ;;  %514 = vmatprep.mubr.f32.mxu1 %v622_v1  ;;  %v22_v4 = vld [vmem:[%s797_s1] sm:$0xff]  ;;  %v39_v8 = vld [vmem:[%s798_s2 + $0x8] sm:$0xff]  ;;  %v41_v9 = vld [vmem:[%s798_s2 + $0x18] sm:$0xff] }
   0x3   :  { %v38_v5 = vld [vmem:[%s798_s2] sm:$0xff]  ;;  %66 = vperm.xlu1 %612, %v40_v7   ;;  %v24_v10 = vld [vmem:[%s797_s1 + $0x10] sm:$0xff]  ;;  %v43_v12 = vld [vmem:[%s798_s2 + $0x28] sm:$0xff] }
   0x4   :  { %558 = vmatprep.subr.msk.mxu0 %vm185_vm0, %v135_v3  ;;  %56 = vperm.xlu0 %611, %v38_v5   ;;  %v42_v11 = vld [vmem:[%s798_s2 + $0x20] sm:$0xff]  ;;  %v25_v13 = vld [vmem:[%s797_s1 + $0x18] sm:$0xff]  ;;  %v44_v14 = vld [vmem:[%s798_s2 + $0x30] sm:$0xff] }
   0x5   :  { %559 = vmatpush1.msk.msra.mxu0 %vm185_vm0, %v21_v0  ;;  %v45_v15 = vld [vmem:[%s798_s2 + $0x38] sm:$0xff]  ;;  %v26_v16 = vld [vmem:[%s797_s1 + $0x20] sm:$0xff]  ;;  %v47_v18 = vld [vmem:[%s798_s2 + $0x48] sm:$0xff] }
   0x6   :  { %560 = vmatmul.mubr.msk.f32.vlgmr.msra.gmra.mrb[0].mxu0 %vm136_vm1, %v22_v4  ;;  %v46_v17 = vld [vmem:[%s798_s2 + $0x40] sm:$0xff]  ;;  %v27_v19 = vld [vmem:[%s797_s1 + $0x28] sm:$0xff]  ;;  %v48_v20 = vld [vmem:[%s798_s2 + $0x50] sm:$0xff] }
   0x7   :  { %260 = vmatprep.mubr.f32.mxu0 %v622_v1  ;;  %71 = vperm.xlu1 %612, %v41_v9   ;;  %v49_v21 = vld [vmem:[%s798_s2 + $0x58] sm:$0xff]  ;;  %v28_v22 = vld [vmem:[%s797_s1 + $0x30] sm:$0xff]  ;;  %v50_v23 = vld [vmem:[%s798_s2 + $0x60] sm:$0xff] }
   0x8   :  { %61 = vperm.xlu0 %611, %v39_v8   ;;  %v51_v24 = vld [vmem:[%s798_s2 + $0x68] sm:$0xff]  ;;  %v29_v25 = vld [vmem:[%s797_s1 + $0x38] sm:$0xff]  ;;  %v52_v26 = vld [vmem:[%s798_s2 + $0x70] sm:$0xff] }
   0x9   :  { %v53_v27 = vld [vmem:[%s798_s2 + $0x78] sm:$0xff]  ;;  %v30_v28 = vld [vmem:[%s797_s1 + $0x40] sm:$0xff]  ;;  %v31_v29 = vld [vmem:[%s797_s1 + $0x48] sm:$0xff] }
   0xa   :  { %561 = vmatmul.mubr.msk.f32.gmra.mrb[2].mxu0 %vm136_vm1, %v23_v6  ;;  %v32_v30 = vld [vmem:[%s797_s1 + $0x50] sm:$0xff]  ;;  %v33_v31 = vld [vmem:[%s797_s1 + $0x58] sm:$0xff]  ;;  %v34_v32 = vld [vmem:[%s797_s1 + $0x60] sm:$0xff] }
   0xb   :  { %266 = vmatprep.mubr.f32.mxu0 %v622_v1  ;;  %81 = vperm.xlu1 %612, %v43_v12   ;;  %v35_v33 = vld [vmem:[%s797_s1 + $0x68] sm:$0xff]  ;;  %v36_v34 = vld [vmem:[%s797_s1 + $0x70] sm:$0xff]  ;;  %v37_v35 = vld [vmem:[%s797_s1 + $0x78] sm:$0xff] }
   0xc   :  { %76 = vperm.xlu0 %611, %v42_v11  }
   0xe   :  { %562 = vmatmul.mubr.msk.f32.gmra.mrb[4].mxu0 %vm136_vm1, %v24_v10 }
   0xf   :  { %272 = vmatprep.mubr.f32.mxu0 %v622_v1  ;;  %91 = vperm.xlu1 %612, %v45_v15  }
  0x10   :  { %86 = vperm.xlu0 %611, %v44_v14  }
  0x12   :  { %563 = vmatmul.mubr.msk.f32.gmra.mrb[6].mxu0 %vm136_vm1, %v25_v13 }
  0x13   :  { %278 = vmatprep.mubr.f32.mxu0 %v622_v1  ;;  %101 = vperm.xlu1 %612, %v47_v18  }
  0x14   :  { %96 = vperm.xlu0 %611, %v46_v17  }
  0x16   :  { %564 = vmatmul.mubr.msk.f32.gmra.mrb[8].mxu0 %vm136_vm1, %v26_v16 }
  0x17   :  { %284 = vmatprep.mubr.f32.mxu0 %v622_v1  ;;  %111 = vperm.xlu1 %612, %v49_v21  }
  0x18   :  { %106 = vperm.xlu0 %611, %v48_v20  }
  0x1a   :  { %565 = vmatmul.mubr.msk.f32.gmra.mrb[10].mxu0 %vm136_vm1, %v27_v19 }
  0x1b   :  { %290 = vmatprep.mubr.f32.mxu0 %v622_v1  ;;  %121 = vperm.xlu1 %612, %v51_v24  }
  0x1c   :  { %116 = vperm.xlu0 %611, %v50_v23  }
  0x1e   :  { %566 = vmatmul.mubr.msk.f32.gmra.mrb[12].mxu0 %vm136_vm1, %v28_v22 }
  0x1f   :  { %296 = vmatprep.mubr.f32.mxu0 %v622_v1  ;;  %131 = vperm.xlu1 %612, %v53_v27  }
  0x20   :  { %126 = vperm.xlu0 %611, %v52_v26  }
  0x22   :  { %567 = vmatmul.mubr.msk.f32.gmra.mrb[14].mxu0 %vm136_vm1, %v29_v25 }
  0x23   :  { %302 = vmatprep.mubr.f32.mxu0 %v622_v1 }
  0x26   :  { %568 = vmatmul.mubr.msk.f32.gmra.mrb[16].mxu0 %vm136_vm1, %v30_v28 }
  0x27   :  { %308 = vmatprep.mubr.f32.mxu0 %v622_v1 }
  0x2a   :  { %569 = vmatmul.mubr.msk.f32.gmra.mrb[18].mxu0 %vm136_vm1, %v31_v29 }
  0x2b   :  { %314 = vmatprep.mubr.f32.mxu0 %v622_v1 }
  0x2e   :  { %570 = vmatmul.mubr.msk.f32.gmra.mrb[20].mxu0 %vm136_vm1, %v32_v30 }
  0x2f   :  { %320 = vmatprep.mubr.f32.mxu0 %v622_v1 }
  0x32   :  { %571 = vmatmul.mubr.msk.f32.gmra.mrb[22].mxu0 %vm136_vm1, %v33_v31 }
  0x33   :  { %326 = vmatprep.mubr.f32.mxu0 %v622_v1 }
  0x36   :  { %572 = vmatmul.mubr.msk.f32.gmra.mrb[24].mxu0 %vm136_vm1, %v34_v32 }
  0x37   :  { %332 = vmatprep.mubr.f32.mxu0 %v622_v1 }
  0x3a   :  { %573 = vmatmul.mubr.msk.f32.gmra.mrb[26].mxu0 %vm136_vm1, %v35_v33 }
  0x3b   :  { %338 = vmatprep.mubr.f32.mxu0 %v622_v1 }
  0x3e   :  { %574 = vmatmul.mubr.msk.f32.gmra.mrb[28].mxu0 %vm136_vm1, %v36_v34 }
  0x3f   :  { %344 = vmatprep.mubr.f32.mxu0 %v622_v1 }
  0x42   :  { %575 = vmatmul.mubr.msk.f32.gmra.mrb[30].mxu0 %vm136_vm1, %v37_v35 }
  0x82   :  { %v67_v47 = vpop.permute.xlu1 %66 }
  0x83   :  { %v57_v36 = vpop.permute.xlu0 %56 }
  0x86   :  { %v72_v61 = vpop.permute.xlu1 %71 }
  0x87   :  { %v62_v41 = vpop.permute.xlu0 %61 }
  0x8a   :  { %v82_v17 = vpop.permute.xlu1 %81 }
  0x8b   :  { %v77_v5 = vpop.permute.xlu0 %76 }
  0x8f   :  { %v87_v25 = vpop.permute.xlu0 %86 }
  0xd9   :  { %v256_v37 = vpop.f32.mrb[0].mxu0 }
  0xda   :  { %v257_v38 = vadd.f32 %v256_v37, %v57_v36  ;;  %v258_v39 = vpop.f32.mrb[1].mxu0  ;;  %v92_v37 = vpop.permute.xlu1 %91 }
  0xdb   :  { %v259_v40 = vadd.f32 %v258_v39, %v57_v36 }
  0xdc   :  { %v383_v43 = vmul.f32 0.2, %v257_v38  ;;  %vm351_vm2 = vcmp.gt.f32.partialorder %v257_v38, 0.0 }
  0xdd   :  { %v262_v42 = vpop.f32.mrb[2].mxu0  ;;  %v384_v46 = vmul.f32 0.2, %v259_v40  ;;  %vm352_vm3 = vcmp.gt.f32.partialorder %v259_v40, 0.0 }
  0xde   :  { %v263_v44 = vadd.f32 %v262_v42, %v62_v41  ;;  %v264_v45 = vpop.f32.mrb[3].mxu0  ;;  %v415_v54 = vsel %vm351_vm2, %v257_v38, %v383_v43 }
  0xdf   :  { %v265_v48 = vadd.f32 %v264_v45, %v62_v41  ;;  %v416_v57 = vsel %vm352_vm3, %v259_v40, %v384_v46  ;;  %v97_v45 = vpop.permute.xlu0 %96 }
  0xe0   :  { %v385_v49 = vmul.f32 0.2, %v263_v44  ;;  %vm353_vm4 = vcmp.gt.f32.partialorder %v263_v44, 0.0 }
  0xe1   :  { %v386_v50 = vmul.f32 0.2, %v265_v48  ;;  %v268_v51 = vpop.f32.mrb[4].mxu0  ;;  %vm354_vm5 = vcmp.gt.f32.partialorder %v265_v48, 0.0 }
  0xe2   :  { %v269_v52 = vadd.f32 %v268_v51, %v67_v47  ;;  %v270_v53 = vpop.f32.mrb[5].mxu0  ;;  %v417_v55 = vsel %vm353_vm4, %v263_v44, %v385_v49 }
  0xe3   :  { %v271_v56 = vadd.f32 %v270_v53, %v67_v47  ;;  %v418_v58 = vsel %vm354_vm5, %v265_v48, %v386_v50  ;;  %v578_v59 = vpack.c.bf16 %v417_v55, %v415_v54 }
  0xe4   :  { %v576_v60 = vpack.c.bf16 %v418_v58, %v416_v57  ;;  %v387_v63 = vmul.f32 0.2, %v269_v52  ;;  %vm355_vm6 = vcmp.gt.f32.partialorder %v269_v52, 0.0  ;;  %v102_v57 = vpop.permute.xlu1 %101 }
  0xe5   :  { %v274_v62 = vpop.f32.mrb[6].mxu0  ;;  %v388_v2 = vmul.f32 0.2, %v271_v56  ;;  %vm356_vm7 = vcmp.gt.f32.partialorder %v271_v56, 0.0 }
  0xe6   :  { %v275_v0 = vadd.f32 %v274_v62, %v72_v61  ;;  %v276_v1 = vpop.f32.mrb[7].mxu0  ;;  %577 = vmatprep.subr.bf16.mxu1 %v576_v60  ;;  %v419_v10 = vsel %vm355_vm6, %v269_v52, %v387_v63 }
  0xe7   :  { %v277_v3 = vadd.f32 %v276_v1, %v72_v61  ;;  %579 = vmatpush1.bf16.msra.mxu1 %v578_v59  ;;  %v420_v13 = vsel %vm356_vm7, %v271_v56, %v388_v2  ;;  %v107_v1 = vpop.permute.xlu0 %106 }
  0xe8   :  { %vm357_vm8 = vcmp.gt.f32.partialorder %v275_v0, 0.0  ;;  %v389_v4 = vmul.f32 0.2, %v275_v0 }
  0xe9   :  { %vm358_vm9 = vcmp.gt.f32.partialorder %v277_v3, 0.0  ;;  %v390_v6 = vmul.f32 0.2, %v277_v3  ;;  %v280_v7 = vpop.f32.mrb[8].mxu0 }
  0xea   :  { %v281_v8 = vadd.f32 %v280_v7, %v77_v5  ;;  %v282_v9 = vpop.f32.mrb[9].mxu0  ;;  %v421_v11 = vsel %vm357_vm8, %v275_v0, %v389_v4 }
  0xeb   :  { %v283_v12 = vadd.f32 %v282_v9, %v77_v5  ;;  %v422_v14 = vsel %vm358_vm9, %v277_v3, %v390_v6  ;;  %v582_v15 = vpack.c.bf16 %v421_v11, %v419_v10 }
  0xec   :  { %v580_v16 = vpack.c.bf16 %v422_v14, %v420_v13  ;;  %v391_v19 = vmul.f32 0.2, %v281_v8  ;;  %vm359_vm10 = vcmp.gt.f32.partialorder %v281_v8, 0.0  ;;  %v112_v13 = vpop.permute.xlu1 %111 }
  0xed   :  { %v286_v18 = vpop.f32.mrb[10].mxu0  ;;  %v392_v22 = vmul.f32 0.2, %v283_v12  ;;  %vm360_vm11 = vcmp.gt.f32.partialorder %v283_v12, 0.0 }
  0xee   :  { %v287_v20 = vadd.f32 %v286_v18, %v82_v17  ;;  %v288_v21 = vpop.f32.mrb[11].mxu0  ;;  %581 = vmatprep.subr.bf16.mxu1 %v580_v16  ;;  %v423_v30 = vsel %vm359_vm10, %v281_v8, %v391_v19 }
  0xef   :  { %v289_v23 = vadd.f32 %v288_v21, %v82_v17  ;;  %583 = vmatpush1.bf16.msra.mxu1 %v582_v15  ;;  %v424_v33 = vsel %vm360_vm11, %v283_v12, %v392_v22  ;;  %v117_v21 = vpop.permute.xlu0 %116 }
  0xf0   :  { %vm361_vm12 = vcmp.gt.f32.partialorder %v287_v20, 0.0  ;;  %v393_v24 = vmul.f32 0.2, %v287_v20 }
  0xf1   :  { %vm362_vm13 = vcmp.gt.f32.partialorder %v289_v23, 0.0  ;;  %v394_v26 = vmul.f32 0.2, %v289_v23  ;;  %v292_v27 = vpop.f32.mrb[12].mxu0 }
  0xf2   :  { %v293_v28 = vadd.f32 %v292_v27, %v87_v25  ;;  %v294_v29 = vpop.f32.mrb[13].mxu0  ;;  %v425_v31 = vsel %vm361_vm12, %v287_v20, %v393_v24 }
  0xf3   :  { %v295_v32 = vadd.f32 %v294_v29, %v87_v25  ;;  %v426_v34 = vsel %vm362_vm13, %v289_v23, %v394_v26  ;;  %v586_v35 = vpack.c.bf16 %v425_v31, %v423_v30 }
  0xf4   :  { %v584_v36 = vpack.c.bf16 %v426_v34, %v424_v33  ;;  %v395_v39 = vmul.f32 0.2, %v293_v28  ;;  %vm363_vm14 = vcmp.gt.f32.partialorder %v293_v28, 0.0  ;;  %v122_v33 = vpop.permute.xlu1 %121 }
  0xf5   :  { %v298_v38 = vpop.f32.mrb[14].mxu0  ;;  %v396_v42 = vmul.f32 0.2, %v295_v32  ;;  %vm364_vm15 = vcmp.gt.f32.partialorder %v295_v32, 0.0 }
  0xf6   :  { %v299_v40 = vadd.f32 %v298_v38, %v92_v37  ;;  %v300_v41 = vpop.f32.mrb[15].mxu0  ;;  %585 = vmatprep.subr.bf16.mxu1 %v584_v36  ;;  %v427_v50 = vsel %vm363_vm14, %v293_v28, %v395_v39 }
  0xf7   :  { %v301_v43 = vadd.f32 %v300_v41, %v92_v37  ;;  %587 = vmatpush1.bf16.msra.mxu1 %v586_v35  ;;  %v428_v53 = vsel %vm364_vm15, %v295_v32, %v396_v42  ;;  %v127_v41 = vpop.permute.xlu0 %126 }
  0xf8   :  { %vm365_vm0 = vcmp.gt.f32.partialorder %v299_v40, 0.0  ;;  %v397_v44 = vmul.f32 0.2, %v299_v40 }
  0xf9   :  { %vm366_vm1 = vcmp.gt.f32.partialorder %v301_v43, 0.0  ;;  %v398_v46 = vmul.f32 0.2, %v301_v43  ;;  %v304_v47 = vpop.f32.mrb[16].mxu0 }
  0xfa   :  { %v305_v48 = vadd.f32 %v304_v47, %v97_v45  ;;  %v306_v49 = vpop.f32.mrb[17].mxu0  ;;  %v429_v51 = vsel %vm365_vm0, %v299_v40, %v397_v44 }
  0xfb   :  { %v307_v52 = vadd.f32 %v306_v49, %v97_v45  ;;  %v430_v54 = vsel %vm366_vm1, %v301_v43, %v398_v46  ;;  %v590_v55 = vpack.c.bf16 %v429_v51, %v427_v50 }
  0xfc   :  { %v588_v56 = vpack.c.bf16 %v430_v54, %v428_v53  ;;  %v399_v59 = vmul.f32 0.2, %v305_v48  ;;  %vm367_vm2 = vcmp.gt.f32.partialorder %v305_v48, 0.0  ;;  %v132_v53 = vpop.permute.xlu1 %131 }
  0xfd   :  { %v310_v58 = vpop.f32.mrb[18].mxu0  ;;  %v400_v62 = vmul.f32 0.2, %v307_v52  ;;  %vm368_vm3 = vcmp.gt.f32.partialorder %v307_v52, 0.0 }
  0xfe   :  { %v311_v60 = vadd.f32 %v310_v58, %v102_v57  ;;  %v312_v61 = vpop.f32.mrb[19].mxu0  ;;  %589 = vmatprep.subr.bf16.mxu1 %v588_v56  ;;  %v431_v6 = vsel %vm367_vm2, %v305_v48, %v399_v59 }
  0xff   :  { %v313_v63 = vadd.f32 %v312_v61, %v102_v57  ;;  %591 = vmatpush1.bf16.msra.mxu1 %v590_v55  ;;  %v432_v9 = vsel %vm368_vm3, %v307_v52, %v400_v62 }
 0x100   :  { %vm369_vm4 = vcmp.gt.f32.partialorder %v311_v60, 0.0  ;;  %v401_v0 = vmul.f32 0.2, %v311_v60 }
 0x101   :  { %vm370_vm5 = vcmp.gt.f32.partialorder %v313_v63, 0.0  ;;  %v402_v2 = vmul.f32 0.2, %v313_v63  ;;  %v316_v3 = vpop.f32.mrb[20].mxu0 }
 0x102   :  { %v317_v4 = vadd.f32 %v316_v3, %v107_v1  ;;  %v318_v5 = vpop.f32.mrb[21].mxu0  ;;  %v433_v7 = vsel %vm369_vm4, %v311_v60, %v401_v0 }
 0x103   :  { %v319_v8 = vadd.f32 %v318_v5, %v107_v1  ;;  %v434_v10 = vsel %vm370_vm5, %v313_v63, %v402_v2  ;;  %v594_v11 = vpack.c.bf16 %v433_v7, %v431_v6  ;;  %v449_v5 = vstv %s800_s4 }
 0x104   :  { %v592_v12 = vpack.c.bf16 %v434_v10, %v432_v9  ;;  %v403_v15 = vmul.f32 0.2, %v317_v4  ;;  %vm371_vm6 = vcmp.gt.f32.partialorder %v317_v4, 0.0 }
 0x105   :  { %v322_v14 = vpop.f32.mrb[22].mxu0  ;;  %v404_v18 = vmul.f32 0.2, %v319_v8  ;;  %vm372_vm7 = vcmp.gt.f32.partialorder %v319_v8, 0.0 }
 0x106   :  { %v323_v16 = vadd.f32 %v322_v14, %v112_v13  ;;  %v324_v17 = vpop.f32.mrb[23].mxu0  ;;  %593 = vmatprep.subr.bf16.mxu1 %v592_v12  ;;  %v435_v26 = vsel %vm371_vm6, %v317_v4, %v403_v15  ;;  %v447_v4 = vld [vmem:[%s799_s3] sm:$0x1] }
 0x107   :  { %v325_v19 = vadd.f32 %v324_v17, %v112_v13  ;;  %595 = vmatpush1.bf16.msra.mxu1 %v594_v11  ;;  %v436_v29 = vsel %vm372_vm7, %v319_v8, %v404_v18  ;;  %v624_v18 = vmov 1966171168  }
 0x108   :  { %vm373_vm8 = vcmp.gt.f32.partialorder %v323_v16, 0.0  ;;  %v405_v20 = vmul.f32 0.2, %v323_v16 }
 0x109   :  { %vm374_vm9 = vcmp.gt.f32.partialorder %v325_v19, 0.0  ;;  %v406_v22 = vmul.f32 0.2, %v325_v19  ;;  %v328_v23 = vpop.f32.mrb[24].mxu0 }
 0x10a   :  { %v329_v24 = vadd.f32 %v328_v23, %v117_v21  ;;  %v330_v25 = vpop.f32.mrb[25].mxu0  ;;  %v437_v27 = vsel %vm373_vm8, %v323_v16, %v405_v20  ;;  %v537_v20 = vlaneseq }
 0x10b   :  { %v331_v28 = vadd.f32 %v330_v25, %v117_v21  ;;  %v438_v30 = vsel %vm374_vm9, %v325_v19, %v406_v22  ;;  %v598_v31 = vpack.c.bf16 %v437_v27, %v435_v26  ;;  %v535_v19 = vunpack.c.l.s4 %v624_v18 }
 0x10c   :  { %v596_v32 = vpack.c.bf16 %v438_v30, %v436_v29  ;;  %v407_v35 = vmul.f32 0.2, %v329_v24  ;;  %vm375_vm10 = vcmp.gt.f32.partialorder %v329_v24, 0.0  ;;  %v538_v22 = vshrl.u32 %v537_v20, 7 }
 0x10d   :  { %v334_v34 = vpop.f32.mrb[26].mxu0  ;;  %v408_v38 = vmul.f32 0.2, %v331_v28  ;;  %vm376_vm11 = vcmp.gt.f32.partialorder %v331_v28, 0.0  ;;  %v536_v21 = vunpack.c.0.s8 %v535_v19  ;;  %vm551_vm2 = vcmp.lt.s32.totalorder %v537_v20, 256 }
 0x10e   :  { %v335_v36 = vadd.f32 %v334_v34, %v122_v33  ;;  %v336_v37 = vpop.f32.mrb[27].mxu0  ;;  %597 = vmatprep.subr.bf16.mxu1 %v596_v32  ;;  %v439_v46 = vsel %vm375_vm10, %v329_v24, %v407_v35 }
 0x10f   :  { %v337_v39 = vadd.f32 %v336_v37, %v122_v33  ;;  %599 = vmatpush1.bf16.msra.mxu1 %v598_v31  ;;  %v440_v49 = vsel %vm376_vm11, %v331_v28, %v408_v38  ;;  %v539_v24 = vsub.s32 %v536_v21, %v538_v22 }
 0x110   :  { %vm377_vm12 = vcmp.gt.f32.partialorder %v335_v36, 0.0  ;;  %v409_v40 = vmul.f32 0.2, %v335_v36 }
 0x111   :  { %vm378_vm13 = vcmp.gt.f32.partialorder %v337_v39, 0.0  ;;  %v410_v42 = vmul.f32 0.2, %v337_v39  ;;  %v340_v43 = vpop.f32.mrb[28].mxu0 }
 0x112   :  { %v341_v44 = vadd.f32 %v340_v43, %v127_v41  ;;  %v342_v45 = vpop.f32.mrb[29].mxu0  ;;  %v441_v47 = vsel %vm377_vm12, %v335_v36, %v409_v40 }
 0x113   :  { %v343_v48 = vadd.f32 %v342_v45, %v127_v41  ;;  %v442_v50 = vsel %vm378_vm13, %v337_v39, %v410_v42  ;;  %v602_v51 = vpack.c.bf16 %v441_v47, %v439_v46 }
 0x114   :  { %v600_v52 = vpack.c.bf16 %v442_v50, %v440_v49  ;;  %v411_v55 = vmul.f32 0.2, %v341_v44  ;;  %vm379_vm14 = vcmp.gt.f32.partialorder %v341_v44, 0.0 }
 0x115   :  { %v346_v54 = vpop.f32.mrb[30].mxu0  ;;  %v412_v58 = vmul.f32 0.2, %v343_v48  ;;  %vm380_vm15 = vcmp.gt.f32.partialorder %v343_v48, 0.0 }
 0x116   :  { %v347_v56 = vadd.f32 %v346_v54, %v132_v53  ;;  %v348_v57 = vpop.f32.mrb[31].mxu0  ;;  %601 = vmatprep.subr.bf16.mxu1 %v600_v52  ;;  %v443_v62 = vsel %vm379_vm14, %v341_v44, %v411_v55 }
 0x117   :  { %v349_v59 = vadd.f32 %v348_v57, %v132_v53  ;;  %603 = vmatpush1.bf16.msra.mxu1 %v602_v51  ;;  %v444_v0 = vsel %vm380_vm15, %v343_v48, %v412_v58 }
 0x118   :  { %vm381_vm0 = vcmp.gt.f32.partialorder %v347_v56, 0.0  ;;  %v413_v60 = vmul.f32 0.2, %v347_v56 }
 0x119   :  { %vm382_vm1 = vcmp.gt.f32.partialorder %v349_v59, 0.0  ;;  %v414_v61 = vmul.f32 0.2, %v349_v59 }
 0x11a   :  { %v445_v63 = vsel %vm381_vm0, %v347_v56, %v413_v60 }
 0x11b   :  { %v446_v1 = vsel %vm382_vm1, %v349_v59, %v414_v61  ;;  %v606_v2 = vpack.c.bf16 %v445_v63, %v443_v62 }
 0x11c   :  { %v604_v3 = vpack.c.bf16 %v446_v1, %v444_v0 }
 0x11e   :  { %605 = vmatprep.subr.bf16.mxu1 %v604_v3 }
 0x11f   :  { %607 = vmatpush1.bf16.msra.mxu1 %v606_v2 }
 0x122   :  { %515 = vmatmul.mubr.f32.vlgmr.msra.gmra.mrb[0].mxu1 %v447_v4 }
 0x1f5   :  { %v516_v6 = vpop.f32.mrb[0].mxu1 }
 0x1f6   :  { %v517_v7 = vadd.f32 %v516_v6, %v449_v5  ;;  %v518_v8 = vpop.f32.mrb[1].mxu1 }
 0x1f7   :  { %v519_v9 = vadd.f32 %v518_v8, %v449_v5 }
 0x1f8   :  { %v521_v10 = vsub.f32 0.0, %v517_v7 }
 0x1f9   :  { %v522_v11 = vsub.f32 0.0, %v519_v9 }
 0x1fa   :  { %v523_v12 = vmul.f32 1.442695, %v521_v10 }
 0x1fb   :  { %v525_v13 = vmul.f32 1.442695, %v522_v11 }
 0x1fc   :  { %614 = vpow2.f32 %v523_v12 }
 0x1fd   :  { %616 = vpow2.f32 %v525_v13 }
 0x206   :  { %v615_v14 = vpop.eup %614 }
 0x207   :  { %v617_v15 = vpop.eup %616  ;;  %v527_v16 = vadd.f32 1.0, %v615_v14 }
 0x208   :  { %v528_v17 = vadd.f32 1.0, %v617_v15 }
 0x209   :  { %618 = vrcp.f32 %v527_v16 }
 0x20a   :  { %620 = vrcp.f32 %v528_v17 }
 0x213   :  { %v619_v23 = vpop.eup %618 }
 0x214   :  { %v621_v25 = vpop.eup %620 }
 0x215   :  { %v533_v26 = vcombine.low %v619_v23, %v621_v25 }
 0x217   :  { %v540_v27 = vrot.slane %v533_v26, %v539_v24 }
 0x219   :  { %v547_v28 = vrot.slane %v540_v27, %v539_v24 }
 0x21b   :  { %553 = vst.msk [vmem:[%s801_s5] sm:$0x3] %vm551_vm2, %v547_v28 }

</bundles_post_ra>
